<compile_context>
chip_gen: v7x
topology: tpu7x:2x2x1
jax: 0.10.0
libtpu: 0.0.40
codegen_flags: <defaults>
</compile_context>

<pallas_src>
import functools

import jax
import jax.numpy as jnp
from jax import lax
from jax.experimental import pallas as pl
from jax.experimental.pallas import tpu as pltpu

_TARGET_BLOCK_ELEMS = 512 * 1024          # ~2 MiB f32 per input per pipeline buffer
_VMEM_LIMIT_BYTES = 40 * 1024 * 1024      # safe on v5e/v6e (128 MiB) and v7x (64 MiB)
_LANE_CHOICES = (1024, 512, 256, 128)     # lane-dense slab widths (multiples of 128)


def _default_num_chunks():
    """2 chunks only where two TensorCores live behind one device (v7x / megacore)."""
    try:
        dev = jax.devices()[0]
        if int(getattr(dev, "num_cores", 0) or 0) >= 2:
            return 2
        kind = str(getattr(dev, "device_kind", "")).lower()
        if any(tag in kind for tag in ("v4", "v5p", "7")):
            return 2
    except Exception:
        pass
    return 1


def _get_output(result):
    # Mirrors AD_Loss.get_loss(result, label): result['output'] if a dict is passed.
    if isinstance(result, dict):
        return result["output"]
    return result


@functools.partial(jax.jit, static_argnames=("num_chunks", "binary_labels"))
def ad_loss(v_result, a_result, f_result, label, *, num_chunks=None, binary_labels=False):
    """Pallas implementation of AD_Loss.forward. Returns (U_MIL_loss, loss_dict)."""
    v_output = _get_output(v_result)
    a_output = _get_output(a_result)
    f_output = _get_output(f_result)

    total = int(label.size)                     # static at trace time
    if num_chunks is None:
        num_chunks = _default_num_chunks()

    # ---- choose lane width; avoid the pad copy whenever possible -----------
    lane = None
    for cand in _LANE_CHOICES:
        if total >= cand and total % cand == 0:
            lane = cand
            break
    needs_pad = lane is None
    if needs_pad:
        lane = _LANE_CHOICES[0]

    rows = pl.cdiv(total, lane)
    padded_total = rows * lane

    max_block_rows = max(8, ((_TARGET_BLOCK_ELEMS // lane) // 8) * 8)
    block_rows = rows if rows <= max_block_rows else max_block_rows
    tiles_needed = pl.cdiv(rows, block_rows)
    chunks = max(1, min(int(num_chunks), tiles_needed))
    tiles_per_chunk = pl.cdiv(tiles_needed, chunks)
    last_block = tiles_needed - 1
    tile_elems = block_rows * lane

    def prep(x):
        x = jnp.reshape(x, (-1,))
        if needs_pad:
            # Fallback only when no lane width divides the element count.
            # Padded values are fully masked in-kernel (value 1.0 merely keeps
            # them inside BCE's (0, 1] domain).
            x = jnp.pad(x, (0, padded_total - total), constant_values=1)
        return jnp.reshape(x, (rows, lane))

    v_p, a_p, f_p, y_p = prep(v_output), prep(a_output), prep(f_output), prep(label)

    # ---- kernel --------------------------------------------------------------
    def kernel(v_ref, a_ref, f_ref, y_ref, out_ref, acc_ref):
        c = pl.program_id(0)
        t = pl.program_id(1)

        @pl.when(t == 0)
        def _init():
            acc_ref[...] = jnp.zeros_like(acc_ref)

        y = y_ref[...].astype(jnp.float32)

        if binary_labels:
            y_pos = y >= 0.5                      # hoisted: shared by all 3 preds
            def terms(p_ref):
                p = p_ref[...].astype(jnp.float32)
                sel = jnp.where(y_pos, p, 1.0 - p)
                # PyTorch BCELoss clamps log outputs at -100.
                return jnp.maximum(jnp.log(sel), -100.0)
        else:
            one_minus_y = 1.0 - y                 # hoisted: shared by all 3 preds
            def terms(p_ref):
                p = p_ref[...].astype(jnp.float32)
                log_p = jnp.maximum(jnp.log(p), -100.0)
                log_1mp = jnp.maximum(jnp.log(1.0 - p), -100.0)
                return y * log_p + one_minus_y * log_1mp

        # Un-negated log-likelihood; sign folded into the wrapper normalization.
        ll = terms(v_ref) + terms(a_ref) + terms(f_ref)

        # Logical element offset of this tile (int32; losses never reach 2^31 elems).
        base = (c * tiles_per_chunk + t) * tile_elems

        @pl.when(base + tile_elems <= total)
        def _full_tile():
            acc_ref[...] += jnp.sum(ll, axis=0, keepdims=True)

        @pl.when(base + tile_elems > total)
        def _tail_tile():
            # Ragged tail / out-of-bounds rows: any garbage loaded in the
            # partial block is masked by true linear index (where() also stops
            # NaN/Inf from the garbage elements propagating).
            row_i = lax.broadcasted_iota(jnp.int32, ll.shape, 0)
            col_i = lax.broadcasted_iota(jnp.int32, ll.shape, 1)
            lin = base + row_i * lane + col_i
            acc_ref[...] += jnp.sum(jnp.where(lin < total, ll, 0.0),
                                    axis=0, keepdims=True)

        @pl.when(t == pl.num_programs(1) - 1)
        def _finalize():
            out_ref[0, 0] = jnp.sum(acc_ref[...])

    def in_index(c, t):
        # Clamp so a phantom trailing tile (odd tile count split across chunks)
        # re-reads the last real block; its contribution is masked to zero.
        return (jnp.minimum(c * tiles_per_chunk + t, last_block), 0)

    in_spec = pl.BlockSpec((block_rows, lane), in_index)

    bytes_accessed = sum(x.size * x.dtype.itemsize for x in (v_p, a_p, f_p, y_p)) + chunks * 4
    cost = pl.CostEstimate(
        flops=(14 if binary_labels else 22) * padded_total,
        transcendentals=(3 if binary_labels else 6) * padded_total,
        bytes_accessed=bytes_accessed,
    )

    partials = pl.pallas_call(
        kernel,
        out_shape=jax.ShapeDtypeStruct((chunks, 1), jnp.float32),
        grid_spec=pltpu.PrefetchScalarGridSpec(
            num_scalar_prefetch=0,
            grid=(chunks, tiles_per_chunk),
            in_specs=[in_spec, in_spec, in_spec, in_spec],
            out_specs=pl.BlockSpec((1, 1), lambda c, t: (c, 0),
                                   memory_space=pltpu.MemorySpace.SMEM),
            scratch_shapes=[pltpu.VMEM((1, lane), jnp.float32)],
        ),
        compiler_params=pltpu.CompilerParams(
            dimension_semantics=("parallel", "arbitrary"),
            vmem_limit_bytes=_VMEM_LIMIT_BYTES,
        ),
        cost_estimate=cost,
    )(v_p, a_p, f_p, y_p)

    # BCELoss(reduction='mean') per prediction, summed across the three streams;
    # the per-element negation was folded into this single scalar multiply.
    u_mil_loss = jnp.sum(partials) * jnp.float32(-1.0 / total)
    loss_dict = {"U_MIL_loss": u_mil_loss}
    return u_mil_loss, loss_dict


if __name__ == "__main__":
    def make_inputs(key, shape):
        kv, ka, kf, kl = jax.random.split(key, 4)
        v = jax.nn.sigmoid(jax.random.normal(kv, shape, dtype=jnp.float32))
        a = jax.nn.sigmoid(jax.random.normal(ka, shape, dtype=jnp.float32))
        f = jax.nn.sigmoid(jax.random.normal(kf, shape, dtype=jnp.float32))
        y = (jax.random.uniform(kl, shape) > 0.5).astype(jnp.float32)
        return v, a, f, y

    def bce_ref(p, y):
        lp = jnp.maximum(jnp.log(p), -100.0)
        l1mp = jnp.maximum(jnp.log(1.0 - p), -100.0)
        return jnp.mean(-(y * lp + (1.0 - y) * l1mp))

    def ref_loss(v, a, f, y):
        return bce_ref(v, y) + bce_ref(a, y) + bce_ref(f, y)

    # 1) Small shape consistent with the module (batch=2, seq=8), dict inputs
    #    matching AD_Loss.forward's (result_dict, label) signature.
    v, a, f, y = make_inputs(jax.random.PRNGKey(0), (2, 8))
    got, loss_dict = ad_loss({"output": v}, {"output": a}, {"output": f}, y)
    jax.block_until_ready(got)
    ref = ref_loss(v, a, f, y)
    assert jnp.allclose(got, ref, rtol=1e-5, atol=1e-5)
    assert jnp.allclose(loss_dict["U_MIL_loss"], ref, rtol=1e-5, atol=1e-5)

    # Binary-label fast path (labels are exactly {0,1} here; same result).
    got_b, _ = ad_loss(v, a, f, y, binary_labels=True)
    jax.block_until_ready(got_b)
    assert jnp.allclose(got_b, ref, rtol=1e-5, atol=1e-5)

    # 2) Ragged, non-lane-divisible shape -> pad fallback + in-kernel masking.
    v2, a2, f2, y2 = make_inputs(jax.random.PRNGKey(1), (7, 3000))
    got2, _ = ad_loss(v2, a2, f2, y2)
    jax.block_until_ready(got2)
    assert jnp.allclose(got2, ref_loss(v2, a2, f2, y2), rtol=1e-4, atol=1e-4)

    # 3) Lane-divisible multi-tile shape -> zero-copy path, partial last block,
    #    two chunks with one phantom (clamped + masked) tile.
    v3, a3, f3, y3 = make_inputs(jax.random.PRNGKey(2), (1050, 1024))
    got3, _ = ad_loss(v3, a3, f3, y3, num_chunks=2)
    jax.block_until_ready(got3)
    assert jnp.allclose(got3, ref_loss(v3, a3, f3, y3), rtol=5e-4, atol=5e-4)

    print("KERNEL_OK")
</pallas_src>

<mosaic_0001>
module attributes {stable_mosaic.version = 11 : i64} {
  func.func @kernel(%arg0: i32, %arg1: i32, %arg2: memref<1x1024xf32, #tpu.memory_space<vmem>>, %arg3: memref<1x1024xf32, #tpu.memory_space<vmem>>, %arg4: memref<1x1024xf32, #tpu.memory_space<vmem>>, %arg5: memref<1x1024xf32, #tpu.memory_space<vmem>>, %arg6: memref<1x1xf32, #tpu.memory_space<smem>>, %arg7: memref<1x1024xf32, #tpu.memory_space<vmem>>) attributes {dimension_semantics = [#tpu.dimension_semantics<parallel>, #tpu.dimension_semantics<arbitrary>], iteration_bounds = array<i64: 1, 1>, scalar_prefetch = 0 : i64, scratch_operands = 1 : i64, tpu.core_type = #tpu.core_type<tc>, window_params = [{transform_indices = @transform_0, window_bounds = array<i64: 1, 1024>}, {transform_indices = @transform_1, window_bounds = array<i64: 1, 1024>}, {transform_indices = @transform_2, window_bounds = array<i64: 1, 1024>}, {transform_indices = @transform_3, window_bounds = array<i64: 1, 1024>}, {transform_indices = @transform_4, window_bounds = array<i64: 1, 1>}]} {
    %c0_i32 = arith.constant 0 : i32
    %0 = arith.cmpi eq, %arg1, %c0_i32 : i32
    %1 = arith.extui %0 : i1 to i32
    %c0_i32_0 = arith.constant 0 : i32
    %2 = arith.cmpi ne, %1, %c0_i32_0 : i32
    scf.if %2 {
      %cst_24 = arith.constant 0.000000e+00 : f32
      %58 = vector.broadcast %cst_24 : f32 to vector<1x1024xf32>
      %c0_25 = arith.constant 0 : index
      %c0_26 = arith.constant 0 : index
      %59 = vector.load %arg7[%c0_25, %c0_26] : memref<1x1024xf32, #tpu.memory_space<vmem>>, vector<1x1024xf32>
      tpu.vector_store %arg7[%c0_25, %c0_26], %58 {strides = array<i32>} : memref<1x1024xf32, #tpu.memory_space<vmem>>, vector<1x1024xf32>,
    } else {
    }
    %c0 = arith.constant 0 : index
    %c0_1 = arith.constant 0 : index
    %3 = vector.load %arg5[%c0, %c0_1] : memref<1x1024xf32, #tpu.memory_space<vmem>>, vector<1x1024xf32>
    %cst = arith.constant 1.000000e+00 : f32
    %4 = vector.broadcast %cst : f32 to vector<1x1024xf32>
    %5 = arith.subf %4, %3 : vector<1x1024xf32>
    %c0_2 = arith.constant 0 : index
    %c0_3 = arith.constant 0 : index
    %6 = vector.load %arg2[%c0_2, %c0_3] : memref<1x1024xf32, #tpu.memory_space<vmem>>, vector<1x1024xf32>
    %7 = math.log %6 : vector<1x1024xf32>
    %cst_4 = arith.constant -1.000000e+02 : f32
    %8 = vector.broadcast %cst_4 : f32 to vector<1x1024xf32>
    %9 = arith.maximumf %7, %8 : vector<1x1024xf32>
    %cst_5 = arith.constant 1.000000e+00 : f32
    %10 = vector.broadcast %cst_5 : f32 to vector<1x1024xf32>
    %11 = arith.subf %10, %6 : vector<1x1024xf32>
    %12 = math.log %11 : vector<1x1024xf32>
    %cst_6 = arith.constant -1.000000e+02 : f32
    %13 = vector.broadcast %cst_6 : f32 to vector<1x1024xf32>
    %14 = arith.maximumf %12, %13 : vector<1x1024xf32>
    %15 = arith.mulf %3, %9 : vector<1x1024xf32>
    %16 = arith.mulf %5, %14 : vector<1x1024xf32>
    %17 = arith.addf %15, %16 : vector<1x1024xf32>
    %c0_7 = arith.constant 0 : index
    %c0_8 = arith.constant 0 : index
    %18 = vector.load %arg3[%c0_7, %c0_8] : memref<1x1024xf32, #tpu.memory_space<vmem>>, vector<1x1024xf32>
    %19 = math.log %18 : vector<1x1024xf32>
    %cst_9 = arith.constant -1.000000e+02 : f32
    %20 = vector.broadcast %cst_9 : f32 to vector<1x1024xf32>
    %21 = arith.maximumf %19, %20 : vector<1x1024xf32>
    %cst_10 = arith.constant 1.000000e+00 : f32
    %22 = vector.broadcast %cst_10 : f32 to vector<1x1024xf32>
    %23 = arith.subf %22, %18 : vector<1x1024xf32>
    %24 = math.log %23 : vector<1x1024xf32>
    %cst_11 = arith.constant -1.000000e+02 : f32
    %25 = vector.broadcast %cst_11 : f32 to vector<1x1024xf32>
    %26 = arith.maximumf %24, %25 : vector<1x1024xf32>
    %27 = arith.mulf %3, %21 : vector<1x1024xf32>
    %28 = arith.mulf %5, %26 : vector<1x1024xf32>
    %29 = arith.addf %27, %28 : vector<1x1024xf32>
    %30 = arith.addf %17, %29 : vector<1x1024xf32>
    %c0_12 = arith.constant 0 : index
    %c0_13 = arith.constant 0 : index
    %31 = vector.load %arg4[%c0_12, %c0_13] : memref<1x1024xf32, #tpu.memory_space<vmem>>, vector<1x1024xf32>
    %32 = math.log %31 : vector<1x1024xf32>
    %cst_14 = arith.constant -1.000000e+02 : f32
    %33 = vector.broadcast %cst_14 : f32 to vector<1x1024xf32>
    %34 = arith.maximumf %32, %33 : vector<1x1024xf32>
    %cst_15 = arith.constant 1.000000e+00 : f32
    %35 = vector.broadcast %cst_15 : f32 to vector<1x1024xf32>
    %36 = arith.subf %35, %31 : vector<1x1024xf32>
    %37 = math.log %36 : vector<1x1024xf32>
    %cst_16 = arith.constant -1.000000e+02 : f32
    %38 = vector.broadcast %cst_16 : f32 to vector<1x1024xf32>
    %39 = arith.maximumf %37, %38 : vector<1x1024xf32>
    %40 = arith.mulf %3, %34 : vector<1x1024xf32>
    %41 = arith.mulf %5, %39 : vector<1x1024xf32>
    %42 = arith.addf %40, %41 : vector<1x1024xf32>
    %43 = arith.addf %30, %42 : vector<1x1024xf32>
    %c1_i32 = arith.constant 1 : i32
    %44 = arith.muli %arg0, %c1_i32 : i32
    %45 = arith.addi %44, %arg1 : i32
    %c1024_i32 = arith.constant 1024 : i32
    %46 = arith.muli %45, %c1024_i32 : i32
    %c1024_i32_17 = arith.constant 1024 : i32
    %47 = arith.addi %46, %c1024_i32_17 : i32
    %c16_i32 = arith.constant 16 : i32
    %48 = arith.cmpi sle, %47, %c16_i32 : i32
    %49 = arith.extui %48 : i1 to i32
    %c0_i32_18 = arith.constant 0 : i32
    %50 = arith.cmpi ne, %49, %c0_i32_18 : i32
    scf.if %50 {
      %c0_24 = arith.constant 0 : index
      %c0_25 = arith.constant 0 : index
      %58 = vector.load %arg7[%c0_24, %c0_25] : memref<1x1024xf32, #tpu.memory_space<vmem>>, vector<1x1024xf32>
      %cst_26 = arith.constant dense<0.000000e+00> : vector<1024xf32>
      %59 = vector.multi_reduction <add>, %43, %cst_26 [0] : vector<1x1024xf32> to vector<1024xf32>
      %60 = vector.shape_cast %59 : vector<1024xf32> to vector<1x1024xf32>
      %61 = arith.addf %58, %60 : vector<1x1024xf32>
      %c0_27 = arith.constant 0 : index
      %c0_28 = arith.constant 0 : index
      %62 = vector.load %arg7[%c0_27, %c0_28] : memref<1x1024xf32, #tpu.memory_space<vmem>>, vector<1x1024xf32>
      tpu.vector_store %arg7[%c0_27, %c0_28], %61 {strides = array<i32>} : memref<1x1024xf32, #tpu.memory_space<vmem>>, vector<1x1024xf32>,
    } else {
    }
    %c1024_i32_19 = arith.constant 1024 : i32
    %51 = arith.addi %46, %c1024_i32_19 : i32
    %c16_i32_20 = arith.constant 16 : i32
    %52 = arith.cmpi sgt, %51, %c16_i32_20 : i32
    %53 = arith.extui %52 : i1 to i32
    %c0_i32_21 = arith.constant 0 : i32
    %54 = arith.cmpi ne, %53, %c0_i32_21 : i32
    scf.if %54 {
      %58 = tpu.iota {dimensions = array<i32: 0>} : vector<1x1024xi32>
      %59 = tpu.iota {dimensions = array<i32: 1>} : vector<1x1024xi32>
      %c1024_i32_24 = arith.constant 1024 : i32
      %60 = vector.broadcast %c1024_i32_24 : i32 to vector<1x1024xi32>
      %61 = arith.muli %58, %60 : vector<1x1024xi32>
      %62 = vector.broadcast %46 : i32 to vector<1x1024xi32>
      %63 = arith.addi %62, %61 : vector<1x1024xi32>
      %64 = arith.addi %63, %59 : vector<1x1024xi32>
      %c0_25 = arith.constant 0 : index
      %c0_26 = arith.constant 0 : index
      %65 = vector.load %arg7[%c0_25, %c0_26] : memref<1x1024xf32, #tpu.memory_space<vmem>>, vector<1x1024xf32>
      %c16_i32_27 = arith.constant 16 : i32
      %66 = vector.broadcast %c16_i32_27 : i32 to vector<1x1024xi32>
      %67 = arith.cmpi slt, %64, %66 : vector<1x1024xi32>
      %cst_28 = arith.constant 0.000000e+00 : f32
      %68 = vector.broadcast %cst_28 : f32 to vector<1x1024xf32>
      %69 = arith.select %67, %43, %68 : vector<1x1024xi1>, vector<1x1024xf32>
      %cst_29 = arith.constant dense<0.000000e+00> : vector<1024xf32>
      %70 = vector.multi_reduction <add>, %69, %cst_29 [0] : vector<1x1024xf32> to vector<1024xf32>
      %71 = vector.shape_cast %70 : vector<1024xf32> to vector<1x1024xf32>
      %72 = arith.addf %65, %71 : vector<1x1024xf32>
      %c0_30 = arith.constant 0 : index
      %c0_31 = arith.constant 0 : index
      %73 = vector.load %arg7[%c0_30, %c0_31] : memref<1x1024xf32, #tpu.memory_space<vmem>>, vector<1x1024xf32>
      tpu.vector_store %arg7[%c0_30, %c0_31], %72 {strides = array<i32>} : memref<1x1024xf32, #tpu.memory_space<vmem>>, vector<1x1024xf32>,
    } else {
    }
    %c0_i32_22 = arith.constant 0 : i32
    %55 = arith.cmpi eq, %arg1, %c0_i32_22 : i32
    %56 = arith.extui %55 : i1 to i32
    %c0_i32_23 = arith.constant 0 : i32
    %57 = arith.cmpi ne, %56, %c0_i32_23 : i32
    scf.if %57 {
      %c0_24 = arith.constant 0 : index
      %c0_25 = arith.constant 0 : index
      %58 = vector.load %arg7[%c0_24, %c0_25] : memref<1x1024xf32, #tpu.memory_space<vmem>>, vector<1x1024xf32>
      %59 = vector.shape_cast %58 : vector<1x1024xf32> to vector<1x1x1024xf32>
      %cst_26 = arith.constant dense<0.000000e+00> : vector<1xf32>
      %60 = vector.multi_reduction <add>, %59, %cst_26 [1, 2] : vector<1x1x1024xf32> to vector<1xf32>
      %61 = vector.shape_cast %60 : vector<1xf32> to vector<1x1x1xf32>
      %62 = vector.extract %61[0, 0, 0] : f32 from vector<1x1x1xf32>
      %c0_27 = arith.constant 0 : index
      %c0_28 = arith.constant 0 : index
      %63 = memref.load %arg6[%c0_27, %c0_28] : memref<1x1xf32, #tpu.memory_space<smem>>
      memref.store %62, %arg6[%c0_27, %c0_28] : memref<1x1xf32, #tpu.memory_space<smem>>
    } else {
    }
    return
  }
  func.func @transform_0(%arg0: i32, %arg1: i32) -> (i32, i32) {
    %c1_i32 = arith.constant 1 : i32
    %0 = arith.muli %arg0, %c1_i32 : i32
    %1 = arith.addi %0, %arg1 : i32
    %c0_i32 = arith.constant 0 : i32
    %2 = arith.minsi %1, %c0_i32 : i32
    %c0_i32_0 = arith.constant 0 : i32
    %c0_i32_1 = arith.constant 0 : i32
    return %2, %c0_i32_0 : i32, i32
  }
  func.func @transform_1(%arg0: i32, %arg1: i32) -> (i32, i32) {
    %c1_i32 = arith.constant 1 : i32
    %0 = arith.muli %arg0, %c1_i32 : i32
    %1 = arith.addi %0, %arg1 : i32
    %c0_i32 = arith.constant 0 : i32
    %2 = arith.minsi %1, %c0_i32 : i32
    %c0_i32_0 = arith.constant 0 : i32
    %c0_i32_1 = arith.constant 0 : i32
    return %2, %c0_i32_0 : i32, i32
  }
  func.func @transform_2(%arg0: i32, %arg1: i32) -> (i32, i32) {
    %c1_i32 = arith.constant 1 : i32
    %0 = arith.muli %arg0, %c1_i32 : i32
    %1 = arith.addi %0, %arg1 : i32
    %c0_i32 = arith.constant 0 : i32
    %2 = arith.minsi %1, %c0_i32 : i32
    %c0_i32_0 = arith.constant 0 : i32
    %c0_i32_1 = arith.constant 0 : i32
    return %2, %c0_i32_0 : i32, i32
  }
  func.func @transform_3(%arg0: i32, %arg1: i32) -> (i32, i32) {
    %c1_i32 = arith.constant 1 : i32
    %0 = arith.muli %arg0, %c1_i32 : i32
    %1 = arith.addi %0, %arg1 : i32
    %c0_i32 = arith.constant 0 : i32
    %2 = arith.minsi %1, %c0_i32 : i32
    %c0_i32_0 = arith.constant 0 : i32
    %c0_i32_1 = arith.constant 0 : i32
    return %2, %c0_i32_0 : i32, i32
  }
  func.func @transform_4(%arg0: i32, %arg1: i32) -> (i32, i32) {
    %c0_i32 = arith.constant 0 : i32
    %c0_i32_0 = arith.constant 0 : i32
    return %arg0, %c0_i32 : i32, i32
  }
}

</mosaic_0001>

<bundles_post_ra>
// kernel: ad_loss.1
= control target key start
LH: loop header
LB: loop body
LE: loop exit
PB: predicated region body
PF: predicated region fallthrough
CT: control target
= control target key end

     0   :  { %s559_s0 = inlined_call_operand.vmem [shape: f32[1,1024], index: 0, kind: input, shape index: {}]   ;;  %s560_s1 = inlined_call_operand.vmem [shape: f32[1,1024], index: 1, kind: input, shape index: {}]   ;;  %s561_s2 = inlined_call_operand.vmem [shape: f32[1,1024], index: 2, kind: input, shape index: {}]   ;;  %s562_s3 = inlined_call_operand.vmem [shape: f32[1,1024], index: 3, kind: input, shape index: {}]   ;;  %s563_s4 = inlined_call_operand.hbm [shape: f32[1,1], index: 4, kind: output, shape index: {}]  }
   0x1   :  { %v133_v0 = vld [vmem:[%s559_s0] sm:$0xff] }
   0x2   :  { %v144_v1 = vld [vmem:[%s560_s1] sm:$0xff]  ;;  %444 = vlog2.f32 %v133_v0  ;;  %v137_v2 = vsub.f32 1.0, %v133_v0 }
   0x3   :  { %v148_v3 = vsub.f32 1.0, %v144_v1  ;;  %v156_v4 = vld [vmem:[%s561_s2] sm:$0xff] }
   0x4   :  { %9 = vsyncpa [#allocation4], 0  ;;  %446 = vlog2.f32 %v144_v1  ;;  %v160_v5 = vsub.f32 1.0, %v156_v4  ;;  %v183_v6 = vlaneseq  ;;  %v131_v7 = vld [vmem:[%s562_s3] sm:$0xff]  ;;  %v468_v14 = vmov 1966171168  }
   0x5   :  { %448 = vlog2.f32 %v137_v2  ;;  %v132_v12 = vsub.f32 1.0, %v131_v7  ;;  %v284_v15 = vunpack.c.l.s4 %v468_v14  ;;  %vm376_vm8 = vcmask 1040384   ;;  %s456_s22 = scalar_lea.hbm %s563_s4, 16 }
   0x6   :  { %450 = vlog2.f32 %v148_v3  ;;  %v186_v8 = vand.u32 127, %v183_v6  ;;  %v507_v10 = vshrl.u32 %v183_v6, 7  ;;  %p457_p0 = scmp.ne.s32.totalorder %s563_s4, %s456_s22  ;;  %p460_p1 = scmp.lt.u32.totalorder %s456_s22, %s563_s4 }
   0x7   :  { %452 = vlog2.f32 %v156_v4  ;;  %v285_v59 = vunpack.c.0.s8 %v284_v15 }
   0x8   :  { %454 = vlog2.f32 %v160_v5  ;;  %v187_v18 = vadd.s32 128, %v186_v8  ;;  %v188_v19 = vadd.s32 256, %v186_v8  ;;  %v189_v20 = vadd.s32 384, %v186_v8  ;;  %p462_p2 = pnand %p460_p1, %p457_p0 }
   0x9   :  { %v190_v24 = vadd.s32 512, %v186_v8  ;;  %v191_v25 = vadd.s32 640, %v186_v8  ;;  %v192_v29 = vadd.s32 768, %v186_v8  ;;  %v194_v30 = vmul.u32 1024, %v507_v10 }
   0xa   :  { %v193_v35 = vadd.s32 896, %v186_v8  ;;  %v217_v39 = vsub.s32 0, %v507_v10  ;;  %v221_v42 = vsub.s32 1, %v507_v10  ;;  %v225_v43 = vsub.s32 2, %v507_v10 }
   0xb   :  { %v197_v46 = vadd.s32 %v194_v30, %v186_v8  ;;  %v229_v47 = vsub.s32 3, %v507_v10  ;;  %v198_v50 = vadd.s32 %v194_v30, %v187_v18  ;;  %v199_v51 = vadd.s32 %v194_v30, %v188_v19 }
   0xc   :  { %v445_v9 = vpop.eup %444  ;;  %v200_v54 = vadd.s32 %v194_v30, %v189_v20  ;;  %v201_v55 = vadd.s32 %v194_v30, %v190_v24  ;;  %v202_v56 = vadd.s32 %v194_v30, %v191_v25  ;;  %v203_v57 = vadd.s32 %v194_v30, %v192_v29 }
   0xd   :  { %v135_v13 = vmul.f32 0.6931472, %v445_v9  ;;  %v204_v58 = vadd.s32 %v194_v30, %v193_v35  ;;  %vm206_vm0 = vcmp.lt.s32.totalorder %v197_v46, 16  ;;  %v233_v62 = vsub.s32 4, %v507_v10 }
   0xe   :  { %v447_v11 = vpop.eup %446  ;;  %vm207_vm1 = vcmp.lt.s32.totalorder %v198_v50, 16  ;;  %v237_v63 = vsub.s32 5, %v507_v10  ;;  %v241_v0 = vsub.s32 6, %v507_v10  ;;  %v245_v1 = vsub.s32 7, %v507_v10 }
   0xf   :  { %v449_v16 = vpop.eup %448  ;;  %v146_v17 = vmul.f32 0.6931472, %v447_v11  ;;  %v136_v22 = vmax.f32 %v135_v13, -100.0  ;;  %vm208_vm2 = vcmp.lt.s32.totalorder %v199_v51, 16  ;;  %vm209_vm3 = vcmp.lt.s32.totalorder %v200_v54, 16 }
  0x10   :  { %v451_v21 = vpop.eup %450  ;;  %v139_v23 = vmul.f32 0.6931472, %v449_v16  ;;  %vm210_vm4 = vcmp.lt.s32.totalorder %v201_v55, 16  ;;  %vm211_vm5 = vcmp.lt.s32.totalorder %v202_v56, 16  ;;  %vm212_vm6 = vcmp.lt.s32.totalorder %v203_v57, 16 }
  0x11   :  { %v453_v26 = vpop.eup %452  ;;  %v147_v27 = vmax.f32 %v146_v17, -100.0  ;;  %v150_v28 = vmul.f32 0.6931472, %v451_v21  ;;  %v141_v33 = vmul.f32 %v136_v22, %v131_v7  ;;  %vm213_vm7 = vcmp.lt.s32.totalorder %v204_v58, 16 }
  0x12   :  { %v455_v31 = vpop.eup %454  ;;  %v140_v32 = vmax.f32 %v139_v23, -100.0  ;;  %v158_v34 = vmul.f32 0.6931472, %v453_v26  ;;  %v288_v3 = vsub.s32 %v285_v59, %v507_v10 }
  0x13   :  { %v151_v36 = vmax.f32 %v150_v28, -100.0  ;;  %v152_v37 = vmul.f32 %v147_v27, %v131_v7  ;;  %v162_v38 = vmul.f32 0.6931472, %v455_v31 }
  0x14   :  { %v142_v40 = vmul.f32 %v140_v32, %v132_v12  ;;  %v159_v41 = vmax.f32 %v158_v34, -100.0 }
  0x15   :  { %v153_v44 = vmul.f32 %v151_v36, %v132_v12  ;;  %v163_v45 = vmax.f32 %v162_v38, -100.0 }
  0x16   :  { %v143_v48 = vadd.f32 %v142_v40, %v141_v33  ;;  %v164_v49 = vmul.f32 %v159_v41, %v131_v7 }
  0x17   :  { %v154_v52 = vadd.f32 %v153_v44, %v152_v37  ;;  %v165_v53 = vmul.f32 %v163_v45, %v132_v12 }
  0x19   :  { %v155_v60 = vadd.f32 %v154_v52, %v143_v48  ;;  %v166_v61 = vadd.f32 %v165_v53, %v164_v49 }
  0x1b   :  { %v167_v2 = vadd.f32 %v166_v61, %v155_v60 }
  0x1d   :  { %v218_v4 = vrot.slane %v167_v2, %v217_v39  ;;  %v222_v5 = vrot.slane %v167_v2, %v221_v42  ;;  %v226_v6 = vrot.slane %v167_v2, %v225_v43  ;;  %v230_v7 = vrot.slane %v167_v2, %v229_v47 }
  0x1e   :  { %v234_v8 = vrot.slane %v167_v2, %v233_v62  ;;  %v238_v9 = vrot.slane %v167_v2, %v237_v63  ;;  %v242_v11 = vrot.slane %v167_v2, %v241_v0  ;;  %v246_v12 = vrot.slane %v167_v2, %v245_v1 }
  0x1f   :  { %v255_v13 = vsel %vm206_vm0, %v218_v4, 0.0  ;;  %v256_v14 = vsel %vm207_vm1, %v222_v5, 0.0  ;;  %v257_v15 = vsel %vm208_vm2, %v226_v6, 0.0  ;;  %v258_v16 = vsel %vm209_vm3, %v230_v7, 0.0 }
  0x20   :  { %v259_v17 = vsel %vm210_vm4, %v234_v8, 0.0  ;;  %v260_v18 = vsel %vm211_vm5, %v238_v9, 0.0  ;;  %v261_v19 = vsel %vm212_vm6, %v242_v11, 0.0  ;;  %v262_v20 = vsel %vm213_vm7, %v246_v12, 0.0 }
  0x21   :  { %v279_v21 = vcombine.low %v255_v13, %v256_v14  ;;  %v280_v22 = vcombine.low %v257_v15, %v258_v16  ;;  %v281_v23 = vcombine.low %v259_v17, %v260_v18  ;;  %v282_v24 = vcombine.low %v261_v19, %v262_v20 }
  0x23   :  { %v289_v25 = vrot.slane %v279_v21, %v288_v3  ;;  %v296_v26 = vrot.slane %v280_v22, %v288_v3  ;;  %v303_v27 = vrot.slane %v281_v23, %v288_v3  ;;  %v310_v28 = vrot.slane %v282_v24, %v288_v3 }
  0x25   :  { %v311_v29 = vcombine.low %v289_v25, %v296_v26  ;;  %v312_v30 = vcombine.low %v303_v27, %v310_v28 }
  0x27   :  { %v319_v31 = vrot.slane %v311_v29, %v288_v3  ;;  %v326_v32 = vrot.slane %v312_v30, %v288_v3 }
  0x29   :  { %v327_v33 = vcombine.low %v319_v31, %v326_v32 }
  0x2b   :  { %v339_v34 = vrot.slane %v327_v33, %v217_v39  ;;  %v343_v35 = vrot.slane %v327_v33, %v221_v42  ;;  %v347_v36 = vrot.slane %v327_v33, %v225_v43  ;;  %v351_v37 = vrot.slane %v327_v33, %v229_v47 }
  0x2c   :  { %v355_v38 = vrot.slane %v327_v33, %v233_v62  ;;  %v359_v46 = vrot.slane %v327_v33, %v237_v63  ;;  %v363_v39 = vrot.slane %v327_v33, %v241_v0  ;;  %v367_v51 = vrot.slane %v327_v33, %v245_v1 }
  0x2d   :  { %v377_v40 = vsel %vm376_vm8, %v339_v34, 0.0  ;;  %v378_v41 = vsel %vm376_vm8, %v343_v35, 0.0  ;;  %v380_v44 = vsel %vm376_vm8, %v347_v36, 0.0  ;;  %v382_v48 = vsel %vm376_vm8, %v351_v37, 0.0 }
  0x2e   :  { %v379_v45 = vadd.f32 %v378_v41, %v377_v40  ;;  %v384_v50 = vsel %vm376_vm8, %v355_v38, 0.0  ;;  %v386_v10 = vsel %vm376_vm8, %v359_v46, 0.0  ;;  %v388_v47 = vsel %vm376_vm8, %v363_v39, 0.0 }
  0x2f   :  { %v390_v53 = vsel %vm376_vm8, %v367_v51, 0.0 }
  0x30   :  { %v381_v49 = vadd.f32 %v380_v44, %v379_v45 }
  0x32   :  { %v383_v42 = vadd.f32 %v382_v48, %v381_v49 }
  0x34   :  { %v385_v43 = vadd.f32 %v384_v50, %v383_v42 }
  0x36   :  { %v387_v52 = vadd.f32 %v386_v10, %v385_v43 }
  0x38   :  { %v389_v54 = vadd.f32 %v388_v47, %v387_v52 }
  0x3a   :  { %v391_v55 = vadd.f32 %v390_v53, %v389_v54 }
  0x3c   :  { %392 = vadd.xlane.f32.xlu0 %v391_v55 }
  0xc9   :  { %v393_v56 = vpop.xlane.xlu0 %392 }
  0xca   :  { %v394_v57 = vrot.slane %v393_v56, 4 }
  0xcc   :  { %v395_v58 = vadd.f32 %v394_v57, %v393_v56 }
  0xce   :  { %v396_v59 = vrot.slane %v395_v58, 2 }
  0xd0   :  { %v397_v60 = vadd.f32 %v396_v59, %v395_v58 }
  0xd2   :  { %v398_v61 = vrot.slane %v397_v60, 1 }
  0xd4   :  { %v399_v62 = vadd.f32 %v398_v61, %v397_v60 }
  0xd6   :  { %440 = vpush %v399_v62 }
 0x107   :  { %s441_s1 = spop %440 }
 0x108   :  { %402 = sst [smem:[#allocation3]] %s441_s1 }
 0x109   :  { %465 = shalt.err (!%p462_p2)
}
 0x10a   :  { %s469_s27 = smov [#allocation3]  }
 0x10b   :  { %410 = dma.smem_to_hbm %s469_s27, 16, %s563_s4, [#allocation4]  }
 0x10c   :  { %466 = dma.done.wait [#allocation4], 16  }
 0x10d   :  { %467 = vsyncadd [#allocation4], 4294967280 }
 0x10e   :  { %414 = sfence }
 0x10f   :  { %415 = vsyncpa [#allocation4], 1 }

</bundles_post_ra>
